<compile_context>
chip_gen: v7x
topology: tpu7x:2x2x1
jax: 0.10.0
libtpu: 0.0.40
codegen_flags: <defaults>
</compile_context>

<pallas_src>
import jax
import jax.numpy as jnp
from jax.experimental import pallas as pl
from jax.experimental.pallas import tpu as pltpu

LANES = 128
_FAST_PATH_ELEMS = 64 * 1024  # below this, plain XLA add beats a kernel launch


def _forward_elementwise(x):
    # Placeholder for the abstract `_forward` (identity). Subclasses should
    # keep this on VPU/EUP/XLU — only added HBM traffic would slow the kernel.
    return x


def _base_activation_kernel(bias_ref, x_ref, o_ref):
    x = x_ref[...]
    b = bias_ref[0]  # runtime f32 scalar from SMEM
    y = _forward_elementwise(x.astype(jnp.float32)) + b
    o_ref[...] = y.astype(o_ref.dtype)


def _round_up(x: int, m: int) -> int:
    return ((x + m - 1) // m) * m


def _vmem_budget():
    """Returns (target_tile_bytes, vmem_limit_bytes) per chip generation."""
    try:
        vmem = int(pltpu.get_tpu_info().vmem_capacity_bytes)
    except Exception:
        vmem = 64 * 1024 * 1024  # conservative (v7x-like) fallback
    if vmem >= 128 * 1024 * 1024:
        # v5e / v6e: 128 MiB physical VMEM; 2x(in+out) double-buffered tiles
        # of 8 MiB -> ~32 MiB used, limit raised to 64 MiB for headroom.
        return 8 * 1024 * 1024, 64 * 1024 * 1024
    # v7x: 64 MiB physical per TC; keep 4x tile <= ~24 MiB, limit <= 48 MiB.
    return 6 * 1024 * 1024, 48 * 1024 * 1024


def base_activation_forward(x: jax.Array, bias, *, block_rows: int | None = None) -> jax.Array:
    """Applies `_forward(x) + bias` elementwise, preserving shape & dtype."""
    orig_shape = x.shape
    orig_dtype = x.dtype
    total = x.size

    # Note: activations are expected to be floating point (FPTensor); integer
    # dtypes (fractional bias would truncate) and odd sizes take the XLA path.
    bias_f32 = jnp.asarray(bias, dtype=jnp.float32).reshape((1,))

    take_fast_path = (
        total < _FAST_PATH_ELEMS
        or total % LANES != 0
        or not jnp.issubdtype(orig_dtype, jnp.floating)
    )
    if take_fast_path:
        out = (_forward_elementwise(x.astype(jnp.float32)) + bias_f32[0]).astype(orig_dtype)
        assert out.shape == orig_shape
        assert out.dtype == orig_dtype
        return out

    rows = total // LANES
    x2d = x.reshape(rows, LANES)  # layout-preserving, no data movement

    target_tile_bytes, vmem_limit_bytes = _vmem_budget()
    itemsize = jnp.dtype(orig_dtype).itemsize
    if block_rows is None:
        # Dtype-aware: keep ~constant tile *bytes* regardless of itemsize.
        block_rows = target_tile_bytes // (LANES * itemsize)
        block_rows = max(512, (block_rows // 32) * 32)  # packed-layout friendly

    if rows <= block_rows:
        # Split into (at least) 2 blocks so the "parallel" grid axis can shard
        # across v7x's two TensorCores; harmless single-core no-op elsewhere.
        br = _round_up(pl.cdiv(rows, 2), 8)
    else:
        br = block_rows
    block_shape = (br, LANES)
    grid = (pl.cdiv(rows, br),)  # ragged last block handled by Pallas masking

    out2d = pl.pallas_call(
        _base_activation_kernel,
        out_shape=jax.ShapeDtypeStruct((rows, LANES), orig_dtype),
        grid_spec=pltpu.PrefetchScalarGridSpec(
            num_scalar_prefetch=0,
            grid=grid,
            in_specs=[
                pl.BlockSpec(memory_space=pltpu.MemorySpace.SMEM),  # bias scalar
                pl.BlockSpec(block_shape, lambda i: (i, 0)),
            ],
            out_specs=pl.BlockSpec(block_shape, lambda i: (i, 0)),
        ),
        compiler_params=pltpu.CompilerParams(
            dimension_semantics=("parallel",),  # shards grid across v7x's 2 TCs
            vmem_limit_bytes=vmem_limit_bytes,
        ),
        cost_estimate=pl.CostEstimate(
            flops=total,
            transcendentals=0,
            bytes_accessed=2 * total * itemsize,
        ),
    )(bias_f32, x2d)

    out = out2d.reshape(orig_shape)

    # Mirror BaseActivation.__check_output
    assert out.shape == orig_shape
    assert out.dtype == orig_dtype
    return out


if __name__ == "__main__":
    bias = 0.5
    key = jax.random.PRNGKey(0)

    # Small NCHW input consistent with the module (takes the XLA fast path).
    x_small = jax.random.normal(key, (2, 4, 16, 16), dtype=jnp.float32)
    out_small = jax.block_until_ready(base_activation_forward(x_small, bias))
    ref_small = x_small + jnp.float32(bias)
    assert out_small.shape == x_small.shape and out_small.dtype == x_small.dtype
    assert jnp.allclose(out_small, ref_small, atol=1e-6)

    # Larger input: exercises the Pallas kernel path with a >=2-step grid
    # (rows = 4096 -> split into two 2048-row blocks).
    x_big = jax.random.normal(jax.random.PRNGKey(0), (4, 8, 128, 128),
                              dtype=jnp.float32)
    out_big = jax.block_until_ready(base_activation_forward(x_big, bias))
    ref_big = x_big + jnp.float32(bias)
    assert out_big.shape == x_big.shape and out_big.dtype == x_big.dtype
    assert jnp.allclose(out_big, ref_big, atol=1e-6)

    # Ragged case: rows = 1500 (not a multiple of 8 or of the block size),
    # locks in Pallas partial-block masking on the last grid step.
    x_ragged = jax.random.normal(jax.random.PRNGKey(0), (3, 5, 100, 128),
                                 dtype=jnp.float32)
    out_ragged = jax.block_until_ready(base_activation_forward(x_ragged, bias))
    ref_ragged = x_ragged + jnp.float32(bias)
    assert out_ragged.shape == x_ragged.shape and out_ragged.dtype == x_ragged.dtype
    assert jnp.allclose(out_ragged, ref_ragged, atol=1e-6)

    # bf16 input: dtype-aware tiling keeps the tile byte footprint constant.
    x_bf16 = jax.random.normal(jax.random.PRNGKey(0), (4, 8, 128, 128),
                               dtype=jnp.bfloat16)
    out_bf16 = jax.block_until_ready(base_activation_forward(x_bf16, bias))
    ref_bf16 = (x_bf16.astype(jnp.float32) + jnp.float32(bias)).astype(jnp.bfloat16)
    assert out_bf16.shape == x_bf16.shape and out_bf16.dtype == x_bf16.dtype
    assert jnp.allclose(out_bf16.astype(jnp.float32), ref_bf16.astype(jnp.float32),
                        atol=1e-2)

    print("KERNEL_OK")
</pallas_src>

<mosaic_0001>
module attributes {stable_mosaic.version = 11 : i64} {
  func.func @_base_activation_kernel(%arg0: i32, %arg1: memref<1xf32, #tpu.memory_space<smem>>, %arg2: memref<2048x128xf32, #tpu.memory_space<vmem>>, %arg3: memref<2048x128xf32, #tpu.memory_space<vmem>>) attributes {dimension_semantics = [#tpu.dimension_semantics<parallel>], iteration_bounds = array<i64: 2>, scalar_prefetch = 0 : i64, scratch_operands = 0 : i64, tpu.core_type = #tpu.core_type<tc>, window_params = [{transform_indices = @transform_0, window_bounds = array<i64: 1>}, {transform_indices = @transform_1, window_bounds = array<i64: 2048, 128>}, {transform_indices = @transform_2, window_bounds = array<i64: 2048, 128>}]} {
    %c0 = arith.constant 0 : index
    %c0_0 = arith.constant 0 : index
    %0 = vector.load %arg2[%c0, %c0_0] : memref<2048x128xf32, #tpu.memory_space<vmem>>, vector<2048x128xf32>
    %c0_1 = arith.constant 0 : index
    %1 = memref.load %arg1[%c0_1] : memref<1xf32, #tpu.memory_space<smem>>
    %2 = vector.broadcast %1 : f32 to vector<2048x128xf32>
    %3 = arith.addf %0, %2 : vector<2048x128xf32>
    %c0_2 = arith.constant 0 : index
    %c0_3 = arith.constant 0 : index
    %4 = vector.load %arg3[%c0_2, %c0_3] : memref<2048x128xf32, #tpu.memory_space<vmem>>, vector<2048x128xf32>
    tpu.vector_store %arg3[%c0_2, %c0_3], %3 {strides = array<i32>} : memref<2048x128xf32, #tpu.memory_space<vmem>>, vector<2048x128xf32>,
    return
  }
  func.func @transform_0(%arg0: i32) -> i32 {
    %c0_i32 = arith.constant 0 : i32
    %c0_i32_0 = arith.constant 0 : i32
    return %c0_i32 : i32
  }
  func.func @transform_1(%arg0: i32) -> (i32, i32) {
    %c0_i32 = arith.constant 0 : i32
    %c0_i32_0 = arith.constant 0 : i32
    return %arg0, %c0_i32 : i32, i32
  }
  func.func @transform_2(%arg0: i32) -> (i32, i32) {
    %c0_i32 = arith.constant 0 : i32
    %c0_i32_0 = arith.constant 0 : i32
    return %arg0, %c0_i32 : i32, i32
  }
}

</mosaic_0001>

<bundles_post_ra>
// kernel: tpu_custom_call.1
= control target key start
LH: loop header
LB: loop body
LE: loop exit
PB: predicated region body
PF: predicated region fallthrough
CT: control target
= control target key end

     0   :  { %s2147_s0 = inlined_call_operand.<no memory space> [shape: f32[1], index: 0, kind: input, shape index: {}]   ;;  %s2148_s1 = inlined_call_operand.hbm [shape: f32[4096,128], index: 1, kind: input, shape index: {}]   ;;  %s2149_s2 = inlined_call_operand.hbm [shape: f32[4096,128], index: 2, kind: output, shape index: {}]  }
   0x1   :  { %7 = sst [smem:[#allocation2]] %s2147_s0 }
   0x2   :  { %8 = vsyncpa [#allocation4], 0 }
   0x3   :  { %10 = vsyncpa [#allocation4 + $0x1], 0 }
   0x4   :  { %11 = vsyncpa [#allocation5], 0 }
   0x5   :  { %13 = vsyncpa [#allocation5 + $0x1], 0  ;;  %s1210_s11 = smov 0   ;;  %s1212_s12 = smov 0  }
   0x6   :  { %s1214_s13 = smov 0   ;;  %s1216_s14 = smov 0  }
   0x7 LB: > { %s1231_s0 = sadd.s32 4294967295, %s1184_s14   ;;  %s1022_s15 = sadd.s32 4294967294, %s1184_s14   ;;  %s1184_s14 = sphi %s1216_s14, %s2162_s14   ;;  %s1180_s13 = sphi %s1214_s13, %s2161_s13   ;;  %s1176_s12 = sphi %s1212_s12, %s2160_s12   ;;  %s1172_s11 = sphi %s1210_s11, %s2159_s11  }
   0x8   : > { %s1235_s16 = sadd.s32 1, %s1184_s14   ;;  %s47_s17 = sadd.s32 1, %s1180_s13 }
   0x9   : > { %s44_s18 = ssub.s32 %s1184_s14, %s1235_s16  ;;  %p54_p0 = scmp.ne.s32.totalorder %s1180_s13, %s1176_s12 }
   0xa   : > { %p45_p1 = scmp.eq.s32.totalorder %s44_s18, 0  ;;  %p55_p2 = scmp.eq.s32.totalorder %s1184_s14, 0 }
   0xb   : > { %p60_p3 = scmp.ne.s32.totalorder %s1176_s12, %s1172_s11  ;;  %p61_p4 = scmp.eq.s32.totalorder %s1231_s0, 0 }
   0xc   : > { %s1247_s19 = scalar_select %p45_p1, %s1180_s13, %s47_s17  }
   0xd   : > { %p1249_p5 = por %p55_p2, %p54_p0  ;;  %p1253_p6 = por %p61_p4, %p60_p3 }
   0xe   : > { %p84_p7 = scmp.eq.s32.totalorder %s1231_s0, 1  ;;  %p90_p8 = scmp.eq.s32.totalorder %s1022_s15, 1 }
   0xf   : > { %p1050_p10 = scmp.lt.s32.totalorder %s1184_s14, 2  ;;  %s113_s24 = sand.u32 1, %s1180_s13  }
  0x10   : > { %p1260_p11 = por %p84_p7, %p54_p0  ;;  %p1264_p12 = por %p90_p8, %p60_p3 }
  0x11   : > { %s1036_s25 = sshll.u32 %s1184_s14, 15  ;;  %s1025_s26 = sshll.u32 %s113_s24, 11 }
  0x12   : > { %s2153_s22 = scalar_select %p1260_p11, 1, 0 }
  0x13   : > { %s2154_s23 = scalar_select %p1264_p12, 1, 0 }
  0x14   : > { %s1273_s29 = scalar_lea.hbm %s2148_s1, %s1036_s25  ;;  %s117_s30 = scalar_lea.vmem [#allocation3], %s1025_s26 }
  0x15   : > { %s124_s3 = sshll.u32 %s117_s30, 4  ;;  %p1277_p13 = pnand %p1050_p10, %p1249_p5  ;;  %s1281_s3 = int_to_ptr.vmem [resolvable:$true] %s124_s3 }
  0x16   : > { %s1283_s5 = scalar_lea.sflag [#allocation4], %s113_s24  ;;  %s1088_s6 = scalar_lea.hbm %s1273_s29, 32768 }
  0x17   : > { %p1089_p0 = scmp.ne.s32.totalorder %s1273_s29, %s1088_s6  ;;  %p1090_p1 = pneg %p1277_p13 }
  0x18   : > { %s1093_s9 = scalar_lea.hbm %s2148_s1, 65536  ;;  %p1094_p4 = scmp.lt.u32.totalorder %s1273_s29, %s2148_s1 }
  0x19   : > { %p1091_p2 = pnand %p1090_p1, %p1089_p0  ;;  %p1095_p5 = scmp.lt.u32.totalorder %s1093_s9, %s1088_s6 }
  0x1a   : > { %p1097_p8 = scmp.lt.u32.totalorder %s1088_s6, %s1273_s29 }
  0x1b   : > { %p1092_p3 = pneg %p1091_p2  ;;  %p1096_p7 = por %p1095_p5, %p1094_p4 }
  0x1d   : > { %p1098_p10 = por %p1097_p8, %p1096_p7 }
  0x1f   : > { %p1099_p9 = pnand %p1098_p10, %p1092_p3 }
  0x21   : > { %1102 = shalt.err (!%p1099_p9)
}
  0x22   : > { %s1103_s17 = scalar_lea.vmem %s1281_s3, 32768  ;;  %s1186_s18 = smov [#allocation3]  }
  0x23   : > { %p1104_p0 = scmp.ne.s32.totalorder %s1281_s3, %s1103_s17  ;;  %s1108_s20 = sshll.u32 %s1186_s18, 4  ;;  %s1109_s20 = int_to_ptr.vmem [resolvable:$false] %s1108_s20 }
  0x24   : > { %s1110_s24 = scalar_lea.vmem %s1109_s20, 65536  ;;  %p1111_p11 = scmp.lt.s32.totalorder %s1281_s3, %s1109_s20 }
  0x25   : > { %p1106_p2 = pnand %p1104_p0, %p1090_p1  ;;  %p1112_p4 = scmp.lt.s32.totalorder %s1110_s24, %s1103_s17 }
  0x27   : > { %p1107_p12 = pneg %p1106_p2  ;;  %p1113_p5 = por %p1112_p4, %p1111_p11 }
  0x29   : > { %p1114_p7 = pnand %p1113_p5, %p1107_p12 }
  0x2b   : > { %1117 = shalt.err (!%p1114_p7)
}
  0x2c   : > { %s1187_s25 = smov 128   ;;  %s1188_s26 = smov 8  }
  0x2d   : > { %1045 = dma.hbm_to_vmem [thread:$0]  (!%p1277_p13), %s1273_s29, 32768, %s1281_s3, %s1283_s5, %s1187_s25, %s1187_s25, %s1188_s26  }
  0x2e   : > { %p1028_p9 = scmp.ge.s32.totalorder %s1184_s14, 1  ;;  %p132_p1 = scmp.lt.s32.totalorder %s1184_s14, 3 }
  0x30   : > { %p133_p3 = pnand %p1028_p9, %p132_p1 }
  0x31   : > { %s1314_s27 = sand.u32 (!%p133_p3), 1, %s1176_s12  }
  0x32   : > { %136 = sbr.rel (%p133_p3) target bundleno = 209 (0xd1), region = 28  ;;  %s1029_s28 = sshll.u32 (!%p133_p3), %s1314_s27, 11 }
  0x33   : > { %s139_s30 = scalar_lea.sflag (!%p133_p3), [#allocation4], %s1314_s27  ;;  %s1318_s6 = scalar_lea.vmem (!%p133_p3), [#allocation3], %s1029_s28 }
  0x39   : > { %1163 = dma.done.wait (%p1253_p6), %s139_s30, 32768  }
  0x3a   : > { %1165 = vsyncadd (%p1253_p6), %s139_s30, 4294934528  ;;  %s421_s29 = sld [smem:[#allocation2]]  ;;  %v165_v0 = vld [vmem:[%s1318_s6] sm:$0xff]  ;;  %v166_v2 = vld [vmem:[%s1318_s6 + $0x8] sm:$0xff]  ;;  %s1341_s21 = scalar_lea.vmem [#allocation6], %s1029_s28 }
  0x3b   : > { %v167_v3 = vld [vmem:[%s1318_s6 + $0x10] sm:$0xff]  ;;  %v168_v7 = vld [vmem:[%s1318_s6 + $0x18] sm:$0xff]  ;;  %v169_v8 = vld [vmem:[%s1318_s6 + $0x20] sm:$0xff]  ;;  %s1037_s3 = sshll.u32 %s1231_s0, 15  ;;  %s949_s4 = sshll.u32 %s1341_s21, 4  ;;  %s2095_s4 = int_to_ptr.vmem [resolvable:$true] %s949_s4 }
  0x3c   : > { %v170_v9 = vld [vmem:[%s1318_s6 + $0x28] sm:$0xff]  ;;  %v171_v13 = vld [vmem:[%s1318_s6 + $0x30] sm:$0xff]  ;;  %v172_v14 = vld [vmem:[%s1318_s6 + $0x38] sm:$0xff]  ;;  %s2093_s7 = scalar_lea.hbm %s2149_s2, %s1037_s3  ;;  %s936_s8 = scalar_lea.sflag [#allocation5], %s1314_s27 }
  0x3d   : > { %v173_v15 = vld [vmem:[%s1318_s6 + $0x40] sm:$0xff]  ;;  %v174_v19 = vld [vmem:[%s1318_s6 + $0x48] sm:$0xff]  ;;  %v175_v20 = vld [vmem:[%s1318_s6 + $0x50] sm:$0xff]  ;;  %s1118_s9 = scalar_lea.vmem %s2095_s4, 32768  ;;  %p2156_p11 = scmp.ne.s32.totalorder %s2153_s22, 0 }
  0x3e   : > { %v176_v21 = vld [vmem:[%s1318_s6 + $0x58] sm:$0xff]  ;;  %v177_v25 = vld [vmem:[%s1318_s6 + $0x60] sm:$0xff]  ;;  %v178_v26 = vld [vmem:[%s1318_s6 + $0x68] sm:$0xff]  ;;  %p1119_p6 = scmp.ne.s32.totalorder %s2095_s4, %s1118_s9  ;;  %s1189_s10 = smov [#allocation6]  }
  0x3f   : > { %v179_v27 = vld [vmem:[%s1318_s6 + $0x70] sm:$0xff]  ;;  %v180_v31 = vld [vmem:[%s1318_s6 + $0x78] sm:$0xff]  ;;  %v181_v32 = vld [vmem:[%s1318_s6 + $0x80] sm:$0xff]  ;;  %s1122_s15 = sshll.u32 %s1189_s10, 4  ;;  %s1123_s15 = int_to_ptr.vmem [resolvable:$false] %s1122_s15 }
  0x40   : > { %v1325_v1 = vstv %s421_s29  ;;  %v182_v33 = vld [vmem:[%s1318_s6 + $0x88] sm:$0xff]  ;;  %v183_v37 = vld [vmem:[%s1318_s6 + $0x90] sm:$0xff]  ;;  %v184_v38 = vld [vmem:[%s1318_s6 + $0x98] sm:$0xff]  ;;  %p1120_p12 = pnand %p1119_p6, %p2156_p11  ;;  %s1124_s17 = scalar_lea.vmem %s1123_s15, 65536 }
  0x41   : > { %v423_v4 = vadd.f32 %v1325_v1, %v165_v0  ;;  %v424_v5 = vadd.f32 %v1325_v1, %v166_v2  ;;  %v425_v6 = vadd.f32 %v1325_v1, %v167_v3  ;;  %v426_v10 = vadd.f32 %v1325_v1, %v168_v7  ;;  %v185_v39 = vld [vmem:[%s1318_s6 + $0xa0] sm:$0xff]  ;;  %v186_v43 = vld [vmem:[%s1318_s6 + $0xa8] sm:$0xff]  ;;  %v187_v44 = vld [vmem:[%s1318_s6 + $0xb0] sm:$0xff]  ;;  %p1125_p8 = scmp.lt.s32.totalorder %s2095_s4, %s1123_s15  ;;  %p1126_p10 = scmp.lt.s32.totalorder %s1124_s17, %s1118_s9 }
  0x42   : > { %v427_v11 = vadd.f32 %v1325_v1, %v169_v8  ;;  %v428_v12 = vadd.f32 %v1325_v1, %v170_v9  ;;  %v429_v16 = vadd.f32 %v1325_v1, %v171_v13  ;;  %v430_v17 = vadd.f32 %v1325_v1, %v172_v14  ;;  %v188_v45 = vld [vmem:[%s1318_s6 + $0xb8] sm:$0xff]  ;;  %v189_v49 = vld [vmem:[%s1318_s6 + $0xc0] sm:$0xff]  ;;  %v190_v50 = vld [vmem:[%s1318_s6 + $0xc8] sm:$0xff]  ;;  %p1121_p13 = pneg %p1120_p12 }
  0x43   : > { %679 = vst [vmem:[%s1341_s21] sm:$0xff] %v423_v4  ;;  %680 = vst [vmem:[%s1341_s21 + $0x8] sm:$0xff] %v424_v5  ;;  %v431_v18 = vadd.f32 %v1325_v1, %v173_v15  ;;  %v432_v22 = vadd.f32 %v1325_v1, %v174_v19  ;;  %v433_v23 = vadd.f32 %v1325_v1, %v175_v20  ;;  %v191_v51 = vld [vmem:[%s1318_s6 + $0xd0] sm:$0xff]  ;;  %v192_v55 = vld [vmem:[%s1318_s6 + $0xd8] sm:$0xff]  ;;  %p1127_p0 = por %p1126_p10, %p1125_p8 }
  0x44   : > { %681 = vst [vmem:[%s1341_s21 + $0x10] sm:$0xff] %v425_v6  ;;  %682 = vst [vmem:[%s1341_s21 + $0x18] sm:$0xff] %v426_v10  ;;  %v434_v24 = vadd.f32 %v1325_v1, %v176_v21  ;;  %v435_v28 = vadd.f32 %v1325_v1, %v177_v25  ;;  %v436_v29 = vadd.f32 %v1325_v1, %v178_v26  ;;  %v193_v56 = vld [vmem:[%s1318_s6 + $0xe0] sm:$0xff]  ;;  %v194_v57 = vld [vmem:[%s1318_s6 + $0xe8] sm:$0xff] }
  0x45   : > { %683 = vst [vmem:[%s1341_s21 + $0x20] sm:$0xff] %v427_v11  ;;  %684 = vst [vmem:[%s1341_s21 + $0x28] sm:$0xff] %v428_v12  ;;  %v437_v30 = vadd.f32 %v1325_v1, %v179_v27  ;;  %v438_v34 = vadd.f32 %v1325_v1, %v180_v31  ;;  %v439_v35 = vadd.f32 %v1325_v1, %v181_v32  ;;  %v195_v61 = vld [vmem:[%s1318_s6 + $0xf0] sm:$0xff]  ;;  %v196_v62 = vld [vmem:[%s1318_s6 + $0xf8] sm:$0xff]  ;;  %p1128_p2 = pnand %p1127_p0, %p1121_p13 }
  0x46   : > { %685 = vst [vmem:[%s1341_s21 + $0x30] sm:$0xff] %v429_v16  ;;  %686 = vst [vmem:[%s1341_s21 + $0x38] sm:$0xff] %v430_v17  ;;  %v440_v36 = vadd.f32 %v1325_v1, %v182_v33  ;;  %v441_v40 = vadd.f32 %v1325_v1, %v183_v37  ;;  %v442_v41 = vadd.f32 %v1325_v1, %v184_v38  ;;  %v197_v63 = vld [vmem:[%s1318_s6 + $0x100] sm:$0xff]  ;;  %v198_v4 = vld [vmem:[%s1318_s6 + $0x108] sm:$0xff] }
  0x47   : > { %687 = vst [vmem:[%s1341_s21 + $0x40] sm:$0xff] %v431_v18  ;;  %688 = vst [vmem:[%s1341_s21 + $0x48] sm:$0xff] %v432_v22  ;;  %v443_v42 = vadd.f32 %v1325_v1, %v185_v39  ;;  %v444_v46 = vadd.f32 %v1325_v1, %v186_v43  ;;  %v445_v47 = vadd.f32 %v1325_v1, %v187_v44  ;;  %v199_v5 = vld [vmem:[%s1318_s6 + $0x110] sm:$0xff]  ;;  %v200_v6 = vld [vmem:[%s1318_s6 + $0x118] sm:$0xff] }
  0x48   : > { %689 = vst [vmem:[%s1341_s21 + $0x50] sm:$0xff] %v433_v23  ;;  %690 = vst [vmem:[%s1341_s21 + $0x58] sm:$0xff] %v434_v24  ;;  %v446_v48 = vadd.f32 %v1325_v1, %v188_v45  ;;  %v447_v52 = vadd.f32 %v1325_v1, %v189_v49  ;;  %v448_v53 = vadd.f32 %v1325_v1, %v190_v50  ;;  %v201_v10 = vld [vmem:[%s1318_s6 + $0x120] sm:$0xff]  ;;  %v202_v11 = vld [vmem:[%s1318_s6 + $0x128] sm:$0xff] }
  0x49   : > { %691 = vst [vmem:[%s1341_s21 + $0x60] sm:$0xff] %v435_v28  ;;  %692 = vst [vmem:[%s1341_s21 + $0x68] sm:$0xff] %v436_v29  ;;  %v449_v54 = vadd.f32 %v1325_v1, %v191_v51  ;;  %v450_v58 = vadd.f32 %v1325_v1, %v192_v55  ;;  %v451_v59 = vadd.f32 %v1325_v1, %v193_v56  ;;  %v203_v12 = vld [vmem:[%s1318_s6 + $0x130] sm:$0xff]  ;;  %v204_v16 = vld [vmem:[%s1318_s6 + $0x138] sm:$0xff] }
  0x4a   : > { %693 = vst [vmem:[%s1341_s21 + $0x70] sm:$0xff] %v437_v30  ;;  %694 = vst [vmem:[%s1341_s21 + $0x78] sm:$0xff] %v438_v34  ;;  %v452_v60 = vadd.f32 %v1325_v1, %v194_v57  ;;  %v453_v0 = vadd.f32 %v1325_v1, %v195_v61  ;;  %v454_v2 = vadd.f32 %v1325_v1, %v196_v62  ;;  %v205_v17 = vld [vmem:[%s1318_s6 + $0x140] sm:$0xff]  ;;  %v206_v18 = vld [vmem:[%s1318_s6 + $0x148] sm:$0xff] }
  0x4b   : > { %695 = vst [vmem:[%s1341_s21 + $0x80] sm:$0xff] %v439_v35  ;;  %696 = vst [vmem:[%s1341_s21 + $0x88] sm:$0xff] %v440_v36  ;;  %v455_v3 = vadd.f32 %v1325_v1, %v197_v63  ;;  %v456_v7 = vadd.f32 %v1325_v1, %v198_v4  ;;  %v457_v8 = vadd.f32 %v1325_v1, %v199_v5  ;;  %v207_v22 = vld [vmem:[%s1318_s6 + $0x150] sm:$0xff]  ;;  %v208_v23 = vld [vmem:[%s1318_s6 + $0x158] sm:$0xff] }
  0x4c   : > { %697 = vst [vmem:[%s1341_s21 + $0x90] sm:$0xff] %v441_v40  ;;  %698 = vst [vmem:[%s1341_s21 + $0x98] sm:$0xff] %v442_v41  ;;  %v458_v9 = vadd.f32 %v1325_v1, %v200_v6  ;;  %v459_v13 = vadd.f32 %v1325_v1, %v201_v10  ;;  %v460_v14 = vadd.f32 %v1325_v1, %v202_v11  ;;  %v209_v24 = vld [vmem:[%s1318_s6 + $0x160] sm:$0xff]  ;;  %v210_v28 = vld [vmem:[%s1318_s6 + $0x168] sm:$0xff] }
  0x4d   : > { %699 = vst [vmem:[%s1341_s21 + $0xa0] sm:$0xff] %v443_v42  ;;  %700 = vst [vmem:[%s1341_s21 + $0xa8] sm:$0xff] %v444_v46  ;;  %v461_v15 = vadd.f32 %v1325_v1, %v203_v12  ;;  %v462_v19 = vadd.f32 %v1325_v1, %v204_v16  ;;  %v463_v20 = vadd.f32 %v1325_v1, %v205_v17  ;;  %v211_v29 = vld [vmem:[%s1318_s6 + $0x170] sm:$0xff]  ;;  %v212_v30 = vld [vmem:[%s1318_s6 + $0x178] sm:$0xff] }
  0x4e   : > { %701 = vst [vmem:[%s1341_s21 + $0xb0] sm:$0xff] %v445_v47  ;;  %702 = vst [vmem:[%s1341_s21 + $0xb8] sm:$0xff] %v446_v48  ;;  %v464_v21 = vadd.f32 %v1325_v1, %v206_v18  ;;  %v465_v25 = vadd.f32 %v1325_v1, %v207_v22  ;;  %v466_v26 = vadd.f32 %v1325_v1, %v208_v23  ;;  %v213_v34 = vld [vmem:[%s1318_s6 + $0x180] sm:$0xff]  ;;  %v214_v35 = vld [vmem:[%s1318_s6 + $0x188] sm:$0xff] }
  0x4f   : > { %703 = vst [vmem:[%s1341_s21 + $0xc0] sm:$0xff] %v447_v52  ;;  %704 = vst [vmem:[%s1341_s21 + $0xc8] sm:$0xff] %v448_v53  ;;  %v467_v27 = vadd.f32 %v1325_v1, %v209_v24  ;;  %v468_v31 = vadd.f32 %v1325_v1, %v210_v28  ;;  %v469_v32 = vadd.f32 %v1325_v1, %v211_v29  ;;  %v215_v36 = vld [vmem:[%s1318_s6 + $0x190] sm:$0xff]  ;;  %v216_v40 = vld [vmem:[%s1318_s6 + $0x198] sm:$0xff] }
  0x50   : > { %705 = vst [vmem:[%s1341_s21 + $0xd0] sm:$0xff] %v449_v54  ;;  %706 = vst [vmem:[%s1341_s21 + $0xd8] sm:$0xff] %v450_v58  ;;  %v470_v33 = vadd.f32 %v1325_v1, %v212_v30  ;;  %v471_v37 = vadd.f32 %v1325_v1, %v213_v34  ;;  %v472_v38 = vadd.f32 %v1325_v1, %v214_v35  ;;  %v217_v41 = vld [vmem:[%s1318_s6 + $0x1a0] sm:$0xff]  ;;  %v218_v42 = vld [vmem:[%s1318_s6 + $0x1a8] sm:$0xff] }
  0x51   : > { %707 = vst [vmem:[%s1341_s21 + $0xe0] sm:$0xff] %v451_v59  ;;  %708 = vst [vmem:[%s1341_s21 + $0xe8] sm:$0xff] %v452_v60  ;;  %v473_v39 = vadd.f32 %v1325_v1, %v215_v36  ;;  %v474_v43 = vadd.f32 %v1325_v1, %v216_v40  ;;  %v475_v44 = vadd.f32 %v1325_v1, %v217_v41  ;;  %v219_v46 = vld [vmem:[%s1318_s6 + $0x1b0] sm:$0xff]  ;;  %v220_v47 = vld [vmem:[%s1318_s6 + $0x1b8] sm:$0xff] }
  0x52   : > { %709 = vst [vmem:[%s1341_s21 + $0xf0] sm:$0xff] %v453_v0  ;;  %710 = vst [vmem:[%s1341_s21 + $0xf8] sm:$0xff] %v454_v2  ;;  %v476_v45 = vadd.f32 %v1325_v1, %v218_v42  ;;  %v221_v48 = vld [vmem:[%s1318_s6 + $0x1c0] sm:$0xff]  ;;  %v477_v49 = vadd.f32 %v1325_v1, %v219_v46  ;;  %v478_v50 = vadd.f32 %v1325_v1, %v220_v47  ;;  %v222_v52 = vld [vmem:[%s1318_s6 + $0x1c8] sm:$0xff] }
  0x53   : > { %711 = vst [vmem:[%s1341_s21 + $0x100] sm:$0xff] %v455_v3  ;;  %712 = vst [vmem:[%s1341_s21 + $0x108] sm:$0xff] %v456_v7  ;;  %v479_v51 = vadd.f32 %v1325_v1, %v221_v48  ;;  %v223_v53 = vld [vmem:[%s1318_s6 + $0x1d0] sm:$0xff]  ;;  %v224_v54 = vld [vmem:[%s1318_s6 + $0x1d8] sm:$0xff]  ;;  %v480_v55 = vadd.f32 %v1325_v1, %v222_v52 }
  0x54   : > { %713 = vst [vmem:[%s1341_s21 + $0x110] sm:$0xff] %v457_v8  ;;  %714 = vst [vmem:[%s1341_s21 + $0x118] sm:$0xff] %v458_v9  ;;  %v481_v56 = vadd.f32 %v1325_v1, %v223_v53  ;;  %v482_v57 = vadd.f32 %v1325_v1, %v224_v54  ;;  %v225_v58 = vld [vmem:[%s1318_s6 + $0x1e0] sm:$0xff]  ;;  %v226_v59 = vld [vmem:[%s1318_s6 + $0x1e8] sm:$0xff] }
  0x55   : > { %715 = vst [vmem:[%s1341_s21 + $0x120] sm:$0xff] %v459_v13  ;;  %716 = vst [vmem:[%s1341_s21 + $0x128] sm:$0xff] %v460_v14  ;;  %v227_v60 = vld [vmem:[%s1318_s6 + $0x1f0] sm:$0xff]  ;;  %v483_v61 = vadd.f32 %v1325_v1, %v225_v58  ;;  %v484_v62 = vadd.f32 %v1325_v1, %v226_v59  ;;  %v228_v0 = vld [vmem:[%s1318_s6 + $0x1f8] sm:$0xff] }
  0x56   : > { %717 = vst [vmem:[%s1341_s21 + $0x130] sm:$0xff] %v461_v15  ;;  %718 = vst [vmem:[%s1341_s21 + $0x138] sm:$0xff] %v462_v19  ;;  %v485_v63 = vadd.f32 %v1325_v1, %v227_v60  ;;  %v229_v2 = vld [vmem:[%s1318_s6 + $0x200] sm:$0xff]  ;;  %v230_v3 = vld [vmem:[%s1318_s6 + $0x208] sm:$0xff]  ;;  %v486_v4 = vadd.f32 %v1325_v1, %v228_v0 }
  0x57   : > { %719 = vst [vmem:[%s1341_s21 + $0x140] sm:$0xff] %v463_v20  ;;  %720 = vst [vmem:[%s1341_s21 + $0x148] sm:$0xff] %v464_v21  ;;  %v487_v5 = vadd.f32 %v1325_v1, %v229_v2  ;;  %v488_v6 = vadd.f32 %v1325_v1, %v230_v3  ;;  %v231_v7 = vld [vmem:[%s1318_s6 + $0x210] sm:$0xff]  ;;  %v232_v8 = vld [vmem:[%s1318_s6 + $0x218] sm:$0xff] }
  0x58   : > { %721 = vst [vmem:[%s1341_s21 + $0x150] sm:$0xff] %v465_v25  ;;  %722 = vst [vmem:[%s1341_s21 + $0x158] sm:$0xff] %v466_v26  ;;  %v233_v9 = vld [vmem:[%s1318_s6 + $0x220] sm:$0xff]  ;;  %v489_v10 = vadd.f32 %v1325_v1, %v231_v7  ;;  %v490_v11 = vadd.f32 %v1325_v1, %v232_v8  ;;  %v234_v13 = vld [vmem:[%s1318_s6 + $0x228] sm:$0xff] }
  0x59   : > { %723 = vst [vmem:[%s1341_s21 + $0x160] sm:$0xff] %v467_v27  ;;  %724 = vst [vmem:[%s1341_s21 + $0x168] sm:$0xff] %v468_v31  ;;  %v491_v12 = vadd.f32 %v1325_v1, %v233_v9  ;;  %v235_v14 = vld [vmem:[%s1318_s6 + $0x230] sm:$0xff]  ;;  %v236_v15 = vld [vmem:[%s1318_s6 + $0x238] sm:$0xff]  ;;  %v492_v16 = vadd.f32 %v1325_v1, %v234_v13 }
  0x5a   : > { %725 = vst [vmem:[%s1341_s21 + $0x170] sm:$0xff] %v469_v32  ;;  %726 = vst [vmem:[%s1341_s21 + $0x178] sm:$0xff] %v470_v33  ;;  %v493_v17 = vadd.f32 %v1325_v1, %v235_v14  ;;  %v494_v18 = vadd.f32 %v1325_v1, %v236_v15  ;;  %v237_v19 = vld [vmem:[%s1318_s6 + $0x240] sm:$0xff]  ;;  %v238_v20 = vld [vmem:[%s1318_s6 + $0x248] sm:$0xff] }
  0x5b   : > { %727 = vst [vmem:[%s1341_s21 + $0x180] sm:$0xff] %v471_v37  ;;  %728 = vst [vmem:[%s1341_s21 + $0x188] sm:$0xff] %v472_v38  ;;  %v239_v21 = vld [vmem:[%s1318_s6 + $0x250] sm:$0xff]  ;;  %v495_v22 = vadd.f32 %v1325_v1, %v237_v19  ;;  %v496_v23 = vadd.f32 %v1325_v1, %v238_v20  ;;  %v240_v25 = vld [vmem:[%s1318_s6 + $0x258] sm:$0xff] }
  0x5c   : > { %729 = vst [vmem:[%s1341_s21 + $0x190] sm:$0xff] %v473_v39  ;;  %730 = vst [vmem:[%s1341_s21 + $0x198] sm:$0xff] %v474_v43  ;;  %v497_v24 = vadd.f32 %v1325_v1, %v239_v21  ;;  %v241_v26 = vld [vmem:[%s1318_s6 + $0x260] sm:$0xff]  ;;  %v242_v27 = vld [vmem:[%s1318_s6 + $0x268] sm:$0xff]  ;;  %v498_v28 = vadd.f32 %v1325_v1, %v240_v25 }
  0x5d   : > { %731 = vst [vmem:[%s1341_s21 + $0x1a0] sm:$0xff] %v475_v44  ;;  %732 = vst [vmem:[%s1341_s21 + $0x1a8] sm:$0xff] %v476_v45  ;;  %v499_v29 = vadd.f32 %v1325_v1, %v241_v26  ;;  %v500_v30 = vadd.f32 %v1325_v1, %v242_v27  ;;  %v243_v31 = vld [vmem:[%s1318_s6 + $0x270] sm:$0xff]  ;;  %v244_v32 = vld [vmem:[%s1318_s6 + $0x278] sm:$0xff] }
  0x5e   : > { %733 = vst [vmem:[%s1341_s21 + $0x1b0] sm:$0xff] %v477_v49  ;;  %734 = vst [vmem:[%s1341_s21 + $0x1b8] sm:$0xff] %v478_v50  ;;  %v245_v33 = vld [vmem:[%s1318_s6 + $0x280] sm:$0xff]  ;;  %v501_v34 = vadd.f32 %v1325_v1, %v243_v31  ;;  %v502_v35 = vadd.f32 %v1325_v1, %v244_v32  ;;  %v246_v37 = vld [vmem:[%s1318_s6 + $0x288] sm:$0xff] }
  0x5f   : > { %735 = vst [vmem:[%s1341_s21 + $0x1c0] sm:$0xff] %v479_v51  ;;  %736 = vst [vmem:[%s1341_s21 + $0x1c8] sm:$0xff] %v480_v55  ;;  %v503_v36 = vadd.f32 %v1325_v1, %v245_v33  ;;  %v247_v38 = vld [vmem:[%s1318_s6 + $0x290] sm:$0xff]  ;;  %v248_v39 = vld [vmem:[%s1318_s6 + $0x298] sm:$0xff]  ;;  %v504_v40 = vadd.f32 %v1325_v1, %v246_v37 }
  0x60   : > { %737 = vst [vmem:[%s1341_s21 + $0x1d0] sm:$0xff] %v481_v56  ;;  %738 = vst [vmem:[%s1341_s21 + $0x1d8] sm:$0xff] %v482_v57  ;;  %v505_v41 = vadd.f32 %v1325_v1, %v247_v38  ;;  %v506_v42 = vadd.f32 %v1325_v1, %v248_v39  ;;  %v249_v43 = vld [vmem:[%s1318_s6 + $0x2a0] sm:$0xff]  ;;  %v250_v44 = vld [vmem:[%s1318_s6 + $0x2a8] sm:$0xff] }
  0x61   : > { %739 = vst [vmem:[%s1341_s21 + $0x1e0] sm:$0xff] %v483_v61  ;;  %740 = vst [vmem:[%s1341_s21 + $0x1e8] sm:$0xff] %v484_v62  ;;  %v251_v45 = vld [vmem:[%s1318_s6 + $0x2b0] sm:$0xff]  ;;  %v507_v46 = vadd.f32 %v1325_v1, %v249_v43  ;;  %v508_v47 = vadd.f32 %v1325_v1, %v250_v44  ;;  %v252_v49 = vld [vmem:[%s1318_s6 + $0x2b8] sm:$0xff] }
  0x62   : > { %741 = vst [vmem:[%s1341_s21 + $0x1f0] sm:$0xff] %v485_v63  ;;  %742 = vst [vmem:[%s1341_s21 + $0x1f8] sm:$0xff] %v486_v4  ;;  %v509_v48 = vadd.f32 %v1325_v1, %v251_v45  ;;  %v253_v50 = vld [vmem:[%s1318_s6 + $0x2c0] sm:$0xff]  ;;  %v254_v51 = vld [vmem:[%s1318_s6 + $0x2c8] sm:$0xff]  ;;  %v510_v52 = vadd.f32 %v1325_v1, %v252_v49 }
  0x63   : > { %743 = vst [vmem:[%s1341_s21 + $0x200] sm:$0xff] %v487_v5  ;;  %744 = vst [vmem:[%s1341_s21 + $0x208] sm:$0xff] %v488_v6  ;;  %v511_v53 = vadd.f32 %v1325_v1, %v253_v50  ;;  %v512_v54 = vadd.f32 %v1325_v1, %v254_v51  ;;  %v255_v55 = vld [vmem:[%s1318_s6 + $0x2d0] sm:$0xff]  ;;  %v256_v56 = vld [vmem:[%s1318_s6 + $0x2d8] sm:$0xff] }
  0x64   : > { %745 = vst [vmem:[%s1341_s21 + $0x210] sm:$0xff] %v489_v10  ;;  %746 = vst [vmem:[%s1341_s21 + $0x218] sm:$0xff] %v490_v11  ;;  %v257_v57 = vld [vmem:[%s1318_s6 + $0x2e0] sm:$0xff]  ;;  %v513_v58 = vadd.f32 %v1325_v1, %v255_v55  ;;  %v514_v59 = vadd.f32 %v1325_v1, %v256_v56  ;;  %v258_v61 = vld [vmem:[%s1318_s6 + $0x2e8] sm:$0xff] }
  0x65   : > { %747 = vst [vmem:[%s1341_s21 + $0x220] sm:$0xff] %v491_v12  ;;  %748 = vst [vmem:[%s1341_s21 + $0x228] sm:$0xff] %v492_v16  ;;  %v515_v60 = vadd.f32 %v1325_v1, %v257_v57  ;;  %v259_v62 = vld [vmem:[%s1318_s6 + $0x2f0] sm:$0xff]  ;;  %v260_v63 = vld [vmem:[%s1318_s6 + $0x2f8] sm:$0xff]  ;;  %v516_v0 = vadd.f32 %v1325_v1, %v258_v61 }
  0x66   : > { %749 = vst [vmem:[%s1341_s21 + $0x230] sm:$0xff] %v493_v17  ;;  %750 = vst [vmem:[%s1341_s21 + $0x238] sm:$0xff] %v494_v18  ;;  %v517_v2 = vadd.f32 %v1325_v1, %v259_v62  ;;  %v518_v3 = vadd.f32 %v1325_v1, %v260_v63  ;;  %v261_v4 = vld [vmem:[%s1318_s6 + $0x300] sm:$0xff]  ;;  %v262_v5 = vld [vmem:[%s1318_s6 + $0x308] sm:$0xff] }
  0x67   : > { %751 = vst [vmem:[%s1341_s21 + $0x240] sm:$0xff] %v495_v22  ;;  %752 = vst [vmem:[%s1341_s21 + $0x248] sm:$0xff] %v496_v23  ;;  %v263_v6 = vld [vmem:[%s1318_s6 + $0x310] sm:$0xff]  ;;  %v519_v7 = vadd.f32 %v1325_v1, %v261_v4  ;;  %v520_v8 = vadd.f32 %v1325_v1, %v262_v5  ;;  %v264_v10 = vld [vmem:[%s1318_s6 + $0x318] sm:$0xff] }
  0x68   : > { %753 = vst [vmem:[%s1341_s21 + $0x250] sm:$0xff] %v497_v24  ;;  %754 = vst [vmem:[%s1341_s21 + $0x258] sm:$0xff] %v498_v28  ;;  %v521_v9 = vadd.f32 %v1325_v1, %v263_v6  ;;  %v265_v11 = vld [vmem:[%s1318_s6 + $0x320] sm:$0xff]  ;;  %v266_v12 = vld [vmem:[%s1318_s6 + $0x328] sm:$0xff]  ;;  %v522_v13 = vadd.f32 %v1325_v1, %v264_v10 }
  0x69   : > { %755 = vst [vmem:[%s1341_s21 + $0x260] sm:$0xff] %v499_v29  ;;  %756 = vst [vmem:[%s1341_s21 + $0x268] sm:$0xff] %v500_v30  ;;  %v523_v14 = vadd.f32 %v1325_v1, %v265_v11  ;;  %v524_v15 = vadd.f32 %v1325_v1, %v266_v12  ;;  %v267_v16 = vld [vmem:[%s1318_s6 + $0x330] sm:$0xff]  ;;  %v268_v17 = vld [vmem:[%s1318_s6 + $0x338] sm:$0xff] }
  0x6a   : > { %757 = vst [vmem:[%s1341_s21 + $0x270] sm:$0xff] %v501_v34  ;;  %758 = vst [vmem:[%s1341_s21 + $0x278] sm:$0xff] %v502_v35  ;;  %v269_v18 = vld [vmem:[%s1318_s6 + $0x340] sm:$0xff]  ;;  %v525_v19 = vadd.f32 %v1325_v1, %v267_v16  ;;  %v526_v20 = vadd.f32 %v1325_v1, %v268_v17  ;;  %v270_v22 = vld [vmem:[%s1318_s6 + $0x348] sm:$0xff] }
  0x6b   : > { %759 = vst [vmem:[%s1341_s21 + $0x280] sm:$0xff] %v503_v36  ;;  %760 = vst [vmem:[%s1341_s21 + $0x288] sm:$0xff] %v504_v40  ;;  %v527_v21 = vadd.f32 %v1325_v1, %v269_v18  ;;  %v271_v23 = vld [vmem:[%s1318_s6 + $0x350] sm:$0xff]  ;;  %v272_v24 = vld [vmem:[%s1318_s6 + $0x358] sm:$0xff]  ;;  %v528_v25 = vadd.f32 %v1325_v1, %v270_v22 }
  0x6c   : > { %761 = vst [vmem:[%s1341_s21 + $0x290] sm:$0xff] %v505_v41  ;;  %762 = vst [vmem:[%s1341_s21 + $0x298] sm:$0xff] %v506_v42  ;;  %v529_v26 = vadd.f32 %v1325_v1, %v271_v23  ;;  %v530_v27 = vadd.f32 %v1325_v1, %v272_v24  ;;  %v273_v28 = vld [vmem:[%s1318_s6 + $0x360] sm:$0xff]  ;;  %v274_v29 = vld [vmem:[%s1318_s6 + $0x368] sm:$0xff] }
  0x6d   : > { %763 = vst [vmem:[%s1341_s21 + $0x2a0] sm:$0xff] %v507_v46  ;;  %764 = vst [vmem:[%s1341_s21 + $0x2a8] sm:$0xff] %v508_v47  ;;  %v275_v30 = vld [vmem:[%s1318_s6 + $0x370] sm:$0xff]  ;;  %v531_v31 = vadd.f32 %v1325_v1, %v273_v28  ;;  %v532_v32 = vadd.f32 %v1325_v1, %v274_v29  ;;  %v276_v34 = vld [vmem:[%s1318_s6 + $0x378] sm:$0xff] }
  0x6e   : > { %765 = vst [vmem:[%s1341_s21 + $0x2b0] sm:$0xff] %v509_v48  ;;  %766 = vst [vmem:[%s1341_s21 + $0x2b8] sm:$0xff] %v510_v52  ;;  %v533_v33 = vadd.f32 %v1325_v1, %v275_v30  ;;  %v277_v35 = vld [vmem:[%s1318_s6 + $0x380] sm:$0xff]  ;;  %v278_v36 = vld [vmem:[%s1318_s6 + $0x388] sm:$0xff]  ;;  %v534_v37 = vadd.f32 %v1325_v1, %v276_v34 }
  0x6f   : > { %767 = vst [vmem:[%s1341_s21 + $0x2c0] sm:$0xff] %v511_v53  ;;  %768 = vst [vmem:[%s1341_s21 + $0x2c8] sm:$0xff] %v512_v54  ;;  %v535_v38 = vadd.f32 %v1325_v1, %v277_v35  ;;  %v536_v39 = vadd.f32 %v1325_v1, %v278_v36  ;;  %v279_v40 = vld [vmem:[%s1318_s6 + $0x390] sm:$0xff]  ;;  %v280_v41 = vld [vmem:[%s1318_s6 + $0x398] sm:$0xff] }
  0x70   : > { %769 = vst [vmem:[%s1341_s21 + $0x2d0] sm:$0xff] %v513_v58  ;;  %770 = vst [vmem:[%s1341_s21 + $0x2d8] sm:$0xff] %v514_v59  ;;  %v281_v42 = vld [vmem:[%s1318_s6 + $0x3a0] sm:$0xff]  ;;  %v537_v43 = vadd.f32 %v1325_v1, %v279_v40  ;;  %v538_v44 = vadd.f32 %v1325_v1, %v280_v41  ;;  %v282_v46 = vld [vmem:[%s1318_s6 + $0x3a8] sm:$0xff] }
  0x71   : > { %771 = vst [vmem:[%s1341_s21 + $0x2e0] sm:$0xff] %v515_v60  ;;  %772 = vst [vmem:[%s1341_s21 + $0x2e8] sm:$0xff] %v516_v0  ;;  %v539_v45 = vadd.f32 %v1325_v1, %v281_v42  ;;  %v283_v47 = vld [vmem:[%s1318_s6 + $0x3b0] sm:$0xff]  ;;  %v284_v48 = vld [vmem:[%s1318_s6 + $0x3b8] sm:$0xff]  ;;  %v540_v49 = vadd.f32 %v1325_v1, %v282_v46 }
  0x72   : > { %773 = vst [vmem:[%s1341_s21 + $0x2f0] sm:$0xff] %v517_v2  ;;  %774 = vst [vmem:[%s1341_s21 + $0x2f8] sm:$0xff] %v518_v3  ;;  %v541_v50 = vadd.f32 %v1325_v1, %v283_v47  ;;  %v542_v51 = vadd.f32 %v1325_v1, %v284_v48  ;;  %v285_v52 = vld [vmem:[%s1318_s6 + $0x3c0] sm:$0xff]  ;;  %v286_v53 = vld [vmem:[%s1318_s6 + $0x3c8] sm:$0xff] }
  0x73   : > { %775 = vst [vmem:[%s1341_s21 + $0x300] sm:$0xff] %v519_v7  ;;  %776 = vst [vmem:[%s1341_s21 + $0x308] sm:$0xff] %v520_v8  ;;  %v287_v54 = vld [vmem:[%s1318_s6 + $0x3d0] sm:$0xff]  ;;  %v543_v55 = vadd.f32 %v1325_v1, %v285_v52  ;;  %v544_v56 = vadd.f32 %v1325_v1, %v286_v53  ;;  %v288_v58 = vld [vmem:[%s1318_s6 + $0x3d8] sm:$0xff] }
  0x74   : > { %777 = vst [vmem:[%s1341_s21 + $0x310] sm:$0xff] %v521_v9  ;;  %778 = vst [vmem:[%s1341_s21 + $0x318] sm:$0xff] %v522_v13  ;;  %v545_v57 = vadd.f32 %v1325_v1, %v287_v54  ;;  %v289_v59 = vld [vmem:[%s1318_s6 + $0x3e0] sm:$0xff]  ;;  %v290_v60 = vld [vmem:[%s1318_s6 + $0x3e8] sm:$0xff]  ;;  %v546_v61 = vadd.f32 %v1325_v1, %v288_v58 }
  0x75   : > { %779 = vst [vmem:[%s1341_s21 + $0x320] sm:$0xff] %v523_v14  ;;  %780 = vst [vmem:[%s1341_s21 + $0x328] sm:$0xff] %v524_v15  ;;  %v547_v62 = vadd.f32 %v1325_v1, %v289_v59  ;;  %v548_v63 = vadd.f32 %v1325_v1, %v290_v60  ;;  %v291_v0 = vld [vmem:[%s1318_s6 + $0x3f0] sm:$0xff]  ;;  %v292_v2 = vld [vmem:[%s1318_s6 + $0x3f8] sm:$0xff] }
  0x76   : > { %781 = vst [vmem:[%s1341_s21 + $0x330] sm:$0xff] %v525_v19  ;;  %782 = vst [vmem:[%s1341_s21 + $0x338] sm:$0xff] %v526_v20  ;;  %v293_v3 = vld [vmem:[%s1318_s6 + $0x400] sm:$0xff]  ;;  %v549_v4 = vadd.f32 %v1325_v1, %v291_v0  ;;  %v550_v5 = vadd.f32 %v1325_v1, %v292_v2  ;;  %v294_v7 = vld [vmem:[%s1318_s6 + $0x408] sm:$0xff] }
  0x77   : > { %783 = vst [vmem:[%s1341_s21 + $0x340] sm:$0xff] %v527_v21  ;;  %784 = vst [vmem:[%s1341_s21 + $0x348] sm:$0xff] %v528_v25  ;;  %v551_v6 = vadd.f32 %v1325_v1, %v293_v3  ;;  %v295_v8 = vld [vmem:[%s1318_s6 + $0x410] sm:$0xff]  ;;  %v296_v9 = vld [vmem:[%s1318_s6 + $0x418] sm:$0xff]  ;;  %v552_v10 = vadd.f32 %v1325_v1, %v294_v7 }
  0x78   : > { %785 = vst [vmem:[%s1341_s21 + $0x350] sm:$0xff] %v529_v26  ;;  %786 = vst [vmem:[%s1341_s21 + $0x358] sm:$0xff] %v530_v27  ;;  %v553_v11 = vadd.f32 %v1325_v1, %v295_v8  ;;  %v554_v12 = vadd.f32 %v1325_v1, %v296_v9  ;;  %v297_v13 = vld [vmem:[%s1318_s6 + $0x420] sm:$0xff]  ;;  %v298_v14 = vld [vmem:[%s1318_s6 + $0x428] sm:$0xff] }
  0x79   : > { %787 = vst [vmem:[%s1341_s21 + $0x360] sm:$0xff] %v531_v31  ;;  %788 = vst [vmem:[%s1341_s21 + $0x368] sm:$0xff] %v532_v32  ;;  %v299_v15 = vld [vmem:[%s1318_s6 + $0x430] sm:$0xff]  ;;  %v555_v16 = vadd.f32 %v1325_v1, %v297_v13  ;;  %v556_v17 = vadd.f32 %v1325_v1, %v298_v14  ;;  %v300_v19 = vld [vmem:[%s1318_s6 + $0x438] sm:$0xff] }
  0x7a   : > { %789 = vst [vmem:[%s1341_s21 + $0x370] sm:$0xff] %v533_v33  ;;  %790 = vst [vmem:[%s1341_s21 + $0x378] sm:$0xff] %v534_v37  ;;  %v557_v18 = vadd.f32 %v1325_v1, %v299_v15  ;;  %v301_v20 = vld [vmem:[%s1318_s6 + $0x440] sm:$0xff]  ;;  %v302_v21 = vld [vmem:[%s1318_s6 + $0x448] sm:$0xff]  ;;  %v558_v22 = vadd.f32 %v1325_v1, %v300_v19 }
  0x7b   : > { %791 = vst [vmem:[%s1341_s21 + $0x380] sm:$0xff] %v535_v38  ;;  %792 = vst [vmem:[%s1341_s21 + $0x388] sm:$0xff] %v536_v39  ;;  %v559_v23 = vadd.f32 %v1325_v1, %v301_v20  ;;  %v560_v24 = vadd.f32 %v1325_v1, %v302_v21  ;;  %v303_v25 = vld [vmem:[%s1318_s6 + $0x450] sm:$0xff]  ;;  %v304_v26 = vld [vmem:[%s1318_s6 + $0x458] sm:$0xff] }
  0x7c   : > { %793 = vst [vmem:[%s1341_s21 + $0x390] sm:$0xff] %v537_v43  ;;  %794 = vst [vmem:[%s1341_s21 + $0x398] sm:$0xff] %v538_v44  ;;  %v305_v27 = vld [vmem:[%s1318_s6 + $0x460] sm:$0xff]  ;;  %v561_v28 = vadd.f32 %v1325_v1, %v303_v25  ;;  %v562_v29 = vadd.f32 %v1325_v1, %v304_v26  ;;  %v306_v31 = vld [vmem:[%s1318_s6 + $0x468] sm:$0xff] }
  0x7d   : > { %795 = vst [vmem:[%s1341_s21 + $0x3a0] sm:$0xff] %v539_v45  ;;  %796 = vst [vmem:[%s1341_s21 + $0x3a8] sm:$0xff] %v540_v49  ;;  %v563_v30 = vadd.f32 %v1325_v1, %v305_v27  ;;  %v307_v32 = vld [vmem:[%s1318_s6 + $0x470] sm:$0xff]  ;;  %v308_v33 = vld [vmem:[%s1318_s6 + $0x478] sm:$0xff]  ;;  %v564_v34 = vadd.f32 %v1325_v1, %v306_v31 }
  0x7e   : > { %797 = vst [vmem:[%s1341_s21 + $0x3b0] sm:$0xff] %v541_v50  ;;  %798 = vst [vmem:[%s1341_s21 + $0x3b8] sm:$0xff] %v542_v51  ;;  %v565_v35 = vadd.f32 %v1325_v1, %v307_v32  ;;  %v566_v36 = vadd.f32 %v1325_v1, %v308_v33  ;;  %v309_v37 = vld [vmem:[%s1318_s6 + $0x480] sm:$0xff]  ;;  %v310_v38 = vld [vmem:[%s1318_s6 + $0x488] sm:$0xff] }
  0x7f   : > { %799 = vst [vmem:[%s1341_s21 + $0x3c0] sm:$0xff] %v543_v55  ;;  %800 = vst [vmem:[%s1341_s21 + $0x3c8] sm:$0xff] %v544_v56  ;;  %v311_v39 = vld [vmem:[%s1318_s6 + $0x490] sm:$0xff]  ;;  %v567_v40 = vadd.f32 %v1325_v1, %v309_v37  ;;  %v568_v41 = vadd.f32 %v1325_v1, %v310_v38  ;;  %v312_v43 = vld [vmem:[%s1318_s6 + $0x498] sm:$0xff] }
  0x80   : > { %801 = vst [vmem:[%s1341_s21 + $0x3d0] sm:$0xff] %v545_v57  ;;  %802 = vst [vmem:[%s1341_s21 + $0x3d8] sm:$0xff] %v546_v61  ;;  %v569_v42 = vadd.f32 %v1325_v1, %v311_v39  ;;  %v313_v44 = vld [vmem:[%s1318_s6 + $0x4a0] sm:$0xff]  ;;  %v314_v45 = vld [vmem:[%s1318_s6 + $0x4a8] sm:$0xff]  ;;  %v570_v46 = vadd.f32 %v1325_v1, %v312_v43 }
  0x81   : > { %803 = vst [vmem:[%s1341_s21 + $0x3e0] sm:$0xff] %v547_v62  ;;  %804 = vst [vmem:[%s1341_s21 + $0x3e8] sm:$0xff] %v548_v63  ;;  %v571_v47 = vadd.f32 %v1325_v1, %v313_v44  ;;  %v572_v48 = vadd.f32 %v1325_v1, %v314_v45  ;;  %v315_v49 = vld [vmem:[%s1318_s6 + $0x4b0] sm:$0xff]  ;;  %v316_v50 = vld [vmem:[%s1318_s6 + $0x4b8] sm:$0xff] }
  0x82   : > { %805 = vst [vmem:[%s1341_s21 + $0x3f0] sm:$0xff] %v549_v4  ;;  %806 = vst [vmem:[%s1341_s21 + $0x3f8] sm:$0xff] %v550_v5  ;;  %v317_v51 = vld [vmem:[%s1318_s6 + $0x4c0] sm:$0xff]  ;;  %v573_v52 = vadd.f32 %v1325_v1, %v315_v49  ;;  %v574_v53 = vadd.f32 %v1325_v1, %v316_v50  ;;  %v318_v55 = vld [vmem:[%s1318_s6 + $0x4c8] sm:$0xff] }
  0x83   : > { %807 = vst [vmem:[%s1341_s21 + $0x400] sm:$0xff] %v551_v6  ;;  %808 = vst [vmem:[%s1341_s21 + $0x408] sm:$0xff] %v552_v10  ;;  %v575_v54 = vadd.f32 %v1325_v1, %v317_v51  ;;  %v319_v56 = vld [vmem:[%s1318_s6 + $0x4d0] sm:$0xff]  ;;  %v320_v57 = vld [vmem:[%s1318_s6 + $0x4d8] sm:$0xff]  ;;  %v576_v58 = vadd.f32 %v1325_v1, %v318_v55 }
  0x84   : > { %809 = vst [vmem:[%s1341_s21 + $0x410] sm:$0xff] %v553_v11  ;;  %810 = vst [vmem:[%s1341_s21 + $0x418] sm:$0xff] %v554_v12  ;;  %v577_v59 = vadd.f32 %v1325_v1, %v319_v56  ;;  %v578_v60 = vadd.f32 %v1325_v1, %v320_v57  ;;  %v321_v61 = vld [vmem:[%s1318_s6 + $0x4e0] sm:$0xff]  ;;  %v322_v62 = vld [vmem:[%s1318_s6 + $0x4e8] sm:$0xff] }
  0x85   : > { %811 = vst [vmem:[%s1341_s21 + $0x420] sm:$0xff] %v555_v16  ;;  %812 = vst [vmem:[%s1341_s21 + $0x428] sm:$0xff] %v556_v17  ;;  %v323_v63 = vld [vmem:[%s1318_s6 + $0x4f0] sm:$0xff]  ;;  %v579_v0 = vadd.f32 %v1325_v1, %v321_v61  ;;  %v580_v2 = vadd.f32 %v1325_v1, %v322_v62  ;;  %v324_v4 = vld [vmem:[%s1318_s6 + $0x4f8] sm:$0xff] }
  0x86   : > { %813 = vst [vmem:[%s1341_s21 + $0x430] sm:$0xff] %v557_v18  ;;  %814 = vst [vmem:[%s1341_s21 + $0x438] sm:$0xff] %v558_v22  ;;  %v581_v3 = vadd.f32 %v1325_v1, %v323_v63  ;;  %v325_v5 = vld [vmem:[%s1318_s6 + $0x500] sm:$0xff]  ;;  %v326_v6 = vld [vmem:[%s1318_s6 + $0x508] sm:$0xff]  ;;  %v582_v7 = vadd.f32 %v1325_v1, %v324_v4 }
  0x87   : > { %815 = vst [vmem:[%s1341_s21 + $0x440] sm:$0xff] %v559_v23  ;;  %816 = vst [vmem:[%s1341_s21 + $0x448] sm:$0xff] %v560_v24  ;;  %v583_v8 = vadd.f32 %v1325_v1, %v325_v5  ;;  %v584_v9 = vadd.f32 %v1325_v1, %v326_v6  ;;  %v327_v10 = vld [vmem:[%s1318_s6 + $0x510] sm:$0xff]  ;;  %v328_v11 = vld [vmem:[%s1318_s6 + $0x518] sm:$0xff] }
  0x88   : > { %817 = vst [vmem:[%s1341_s21 + $0x450] sm:$0xff] %v561_v28  ;;  %818 = vst [vmem:[%s1341_s21 + $0x458] sm:$0xff] %v562_v29  ;;  %v329_v12 = vld [vmem:[%s1318_s6 + $0x520] sm:$0xff]  ;;  %v585_v13 = vadd.f32 %v1325_v1, %v327_v10  ;;  %v586_v14 = vadd.f32 %v1325_v1, %v328_v11  ;;  %v330_v16 = vld [vmem:[%s1318_s6 + $0x528] sm:$0xff] }
  0x89   : > { %819 = vst [vmem:[%s1341_s21 + $0x460] sm:$0xff] %v563_v30  ;;  %820 = vst [vmem:[%s1341_s21 + $0x468] sm:$0xff] %v564_v34  ;;  %v587_v15 = vadd.f32 %v1325_v1, %v329_v12  ;;  %v331_v17 = vld [vmem:[%s1318_s6 + $0x530] sm:$0xff]  ;;  %v332_v18 = vld [vmem:[%s1318_s6 + $0x538] sm:$0xff]  ;;  %v588_v19 = vadd.f32 %v1325_v1, %v330_v16 }
  0x8a   : > { %821 = vst [vmem:[%s1341_s21 + $0x470] sm:$0xff] %v565_v35  ;;  %822 = vst [vmem:[%s1341_s21 + $0x478] sm:$0xff] %v566_v36  ;;  %v589_v20 = vadd.f32 %v1325_v1, %v331_v17  ;;  %v590_v21 = vadd.f32 %v1325_v1, %v332_v18  ;;  %v333_v22 = vld [vmem:[%s1318_s6 + $0x540] sm:$0xff]  ;;  %v334_v23 = vld [vmem:[%s1318_s6 + $0x548] sm:$0xff] }
  0x8b   : > { %823 = vst [vmem:[%s1341_s21 + $0x480] sm:$0xff] %v567_v40  ;;  %824 = vst [vmem:[%s1341_s21 + $0x488] sm:$0xff] %v568_v41  ;;  %v335_v24 = vld [vmem:[%s1318_s6 + $0x550] sm:$0xff]  ;;  %v591_v25 = vadd.f32 %v1325_v1, %v333_v22  ;;  %v592_v26 = vadd.f32 %v1325_v1, %v334_v23  ;;  %v336_v28 = vld [vmem:[%s1318_s6 + $0x558] sm:$0xff] }
  0x8c   : > { %825 = vst [vmem:[%s1341_s21 + $0x490] sm:$0xff] %v569_v42  ;;  %826 = vst [vmem:[%s1341_s21 + $0x498] sm:$0xff] %v570_v46  ;;  %v593_v27 = vadd.f32 %v1325_v1, %v335_v24  ;;  %v337_v29 = vld [vmem:[%s1318_s6 + $0x560] sm:$0xff]  ;;  %v338_v30 = vld [vmem:[%s1318_s6 + $0x568] sm:$0xff]  ;;  %v594_v31 = vadd.f32 %v1325_v1, %v336_v28 }
  0x8d   : > { %827 = vst [vmem:[%s1341_s21 + $0x4a0] sm:$0xff] %v571_v47  ;;  %828 = vst [vmem:[%s1341_s21 + $0x4a8] sm:$0xff] %v572_v48  ;;  %v595_v32 = vadd.f32 %v1325_v1, %v337_v29  ;;  %v596_v33 = vadd.f32 %v1325_v1, %v338_v30  ;;  %v339_v34 = vld [vmem:[%s1318_s6 + $0x570] sm:$0xff]  ;;  %v340_v35 = vld [vmem:[%s1318_s6 + $0x578] sm:$0xff] }
  0x8e   : > { %829 = vst [vmem:[%s1341_s21 + $0x4b0] sm:$0xff] %v573_v52  ;;  %830 = vst [vmem:[%s1341_s21 + $0x4b8] sm:$0xff] %v574_v53  ;;  %v341_v36 = vld [vmem:[%s1318_s6 + $0x580] sm:$0xff]  ;;  %v597_v37 = vadd.f32 %v1325_v1, %v339_v34  ;;  %v598_v38 = vadd.f32 %v1325_v1, %v340_v35  ;;  %v342_v40 = vld [vmem:[%s1318_s6 + $0x588] sm:$0xff] }
  0x8f   : > { %831 = vst [vmem:[%s1341_s21 + $0x4c0] sm:$0xff] %v575_v54  ;;  %832 = vst [vmem:[%s1341_s21 + $0x4c8] sm:$0xff] %v576_v58  ;;  %v599_v39 = vadd.f32 %v1325_v1, %v341_v36  ;;  %v343_v41 = vld [vmem:[%s1318_s6 + $0x590] sm:$0xff]  ;;  %v344_v42 = vld [vmem:[%s1318_s6 + $0x598] sm:$0xff]  ;;  %v600_v43 = vadd.f32 %v1325_v1, %v342_v40 }
  0x90   : > { %833 = vst [vmem:[%s1341_s21 + $0x4d0] sm:$0xff] %v577_v59  ;;  %834 = vst [vmem:[%s1341_s21 + $0x4d8] sm:$0xff] %v578_v60  ;;  %v601_v44 = vadd.f32 %v1325_v1, %v343_v41  ;;  %v602_v45 = vadd.f32 %v1325_v1, %v344_v42  ;;  %v345_v46 = vld [vmem:[%s1318_s6 + $0x5a0] sm:$0xff]  ;;  %v346_v47 = vld [vmem:[%s1318_s6 + $0x5a8] sm:$0xff] }
  0x91   : > { %835 = vst [vmem:[%s1341_s21 + $0x4e0] sm:$0xff] %v579_v0  ;;  %836 = vst [vmem:[%s1341_s21 + $0x4e8] sm:$0xff] %v580_v2  ;;  %v347_v48 = vld [vmem:[%s1318_s6 + $0x5b0] sm:$0xff]  ;;  %v603_v49 = vadd.f32 %v1325_v1, %v345_v46  ;;  %v604_v50 = vadd.f32 %v1325_v1, %v346_v47  ;;  %v348_v52 = vld [vmem:[%s1318_s6 + $0x5b8] sm:$0xff] }
  0x92   : > { %837 = vst [vmem:[%s1341_s21 + $0x4f0] sm:$0xff] %v581_v3  ;;  %838 = vst [vmem:[%s1341_s21 + $0x4f8] sm:$0xff] %v582_v7  ;;  %v605_v51 = vadd.f32 %v1325_v1, %v347_v48  ;;  %v349_v53 = vld [vmem:[%s1318_s6 + $0x5c0] sm:$0xff]  ;;  %v350_v54 = vld [vmem:[%s1318_s6 + $0x5c8] sm:$0xff]  ;;  %v606_v55 = vadd.f32 %v1325_v1, %v348_v52 }
  0x93   : > { %839 = vst [vmem:[%s1341_s21 + $0x500] sm:$0xff] %v583_v8  ;;  %840 = vst [vmem:[%s1341_s21 + $0x508] sm:$0xff] %v584_v9  ;;  %v607_v56 = vadd.f32 %v1325_v1, %v349_v53  ;;  %v608_v57 = vadd.f32 %v1325_v1, %v350_v54  ;;  %v351_v58 = vld [vmem:[%s1318_s6 + $0x5d0] sm:$0xff]  ;;  %v352_v59 = vld [vmem:[%s1318_s6 + $0x5d8] sm:$0xff] }
  0x94   : > { %841 = vst [vmem:[%s1341_s21 + $0x510] sm:$0xff] %v585_v13  ;;  %842 = vst [vmem:[%s1341_s21 + $0x518] sm:$0xff] %v586_v14  ;;  %v353_v60 = vld [vmem:[%s1318_s6 + $0x5e0] sm:$0xff]  ;;  %v609_v61 = vadd.f32 %v1325_v1, %v351_v58  ;;  %v610_v62 = vadd.f32 %v1325_v1, %v352_v59  ;;  %v354_v0 = vld [vmem:[%s1318_s6 + $0x5e8] sm:$0xff] }
  0x95   : > { %843 = vst [vmem:[%s1341_s21 + $0x520] sm:$0xff] %v587_v15  ;;  %844 = vst [vmem:[%s1341_s21 + $0x528] sm:$0xff] %v588_v19  ;;  %v611_v63 = vadd.f32 %v1325_v1, %v353_v60  ;;  %v355_v2 = vld [vmem:[%s1318_s6 + $0x5f0] sm:$0xff]  ;;  %v356_v3 = vld [vmem:[%s1318_s6 + $0x5f8] sm:$0xff]  ;;  %v612_v4 = vadd.f32 %v1325_v1, %v354_v0 }
  0x96   : > { %845 = vst [vmem:[%s1341_s21 + $0x530] sm:$0xff] %v589_v20  ;;  %846 = vst [vmem:[%s1341_s21 + $0x538] sm:$0xff] %v590_v21  ;;  %v613_v5 = vadd.f32 %v1325_v1, %v355_v2  ;;  %v614_v6 = vadd.f32 %v1325_v1, %v356_v3  ;;  %v357_v7 = vld [vmem:[%s1318_s6 + $0x600] sm:$0xff]  ;;  %v358_v8 = vld [vmem:[%s1318_s6 + $0x608] sm:$0xff] }
  0x97   : > { %847 = vst [vmem:[%s1341_s21 + $0x540] sm:$0xff] %v591_v25  ;;  %848 = vst [vmem:[%s1341_s21 + $0x548] sm:$0xff] %v592_v26  ;;  %v359_v9 = vld [vmem:[%s1318_s6 + $0x610] sm:$0xff]  ;;  %v615_v10 = vadd.f32 %v1325_v1, %v357_v7  ;;  %v616_v11 = vadd.f32 %v1325_v1, %v358_v8  ;;  %v360_v13 = vld [vmem:[%s1318_s6 + $0x618] sm:$0xff] }
  0x98   : > { %849 = vst [vmem:[%s1341_s21 + $0x550] sm:$0xff] %v593_v27  ;;  %850 = vst [vmem:[%s1341_s21 + $0x558] sm:$0xff] %v594_v31  ;;  %v617_v12 = vadd.f32 %v1325_v1, %v359_v9  ;;  %v361_v14 = vld [vmem:[%s1318_s6 + $0x620] sm:$0xff]  ;;  %v362_v15 = vld [vmem:[%s1318_s6 + $0x628] sm:$0xff]  ;;  %v618_v16 = vadd.f32 %v1325_v1, %v360_v13 }
  0x99   : > { %851 = vst [vmem:[%s1341_s21 + $0x560] sm:$0xff] %v595_v32  ;;  %852 = vst [vmem:[%s1341_s21 + $0x568] sm:$0xff] %v596_v33  ;;  %v619_v17 = vadd.f32 %v1325_v1, %v361_v14  ;;  %v620_v18 = vadd.f32 %v1325_v1, %v362_v15  ;;  %v363_v19 = vld [vmem:[%s1318_s6 + $0x630] sm:$0xff]  ;;  %v364_v20 = vld [vmem:[%s1318_s6 + $0x638] sm:$0xff] }
  0x9a   : > { %853 = vst [vmem:[%s1341_s21 + $0x570] sm:$0xff] %v597_v37  ;;  %854 = vst [vmem:[%s1341_s21 + $0x578] sm:$0xff] %v598_v38  ;;  %v365_v21 = vld [vmem:[%s1318_s6 + $0x640] sm:$0xff]  ;;  %v621_v22 = vadd.f32 %v1325_v1, %v363_v19  ;;  %v622_v23 = vadd.f32 %v1325_v1, %v364_v20  ;;  %v366_v25 = vld [vmem:[%s1318_s6 + $0x648] sm:$0xff] }
  0x9b   : > { %855 = vst [vmem:[%s1341_s21 + $0x580] sm:$0xff] %v599_v39  ;;  %856 = vst [vmem:[%s1341_s21 + $0x588] sm:$0xff] %v600_v43  ;;  %v623_v24 = vadd.f32 %v1325_v1, %v365_v21  ;;  %v367_v26 = vld [vmem:[%s1318_s6 + $0x650] sm:$0xff]  ;;  %v368_v27 = vld [vmem:[%s1318_s6 + $0x658] sm:$0xff]  ;;  %v624_v28 = vadd.f32 %v1325_v1, %v366_v25 }
  0x9c   : > { %857 = vst [vmem:[%s1341_s21 + $0x590] sm:$0xff] %v601_v44  ;;  %858 = vst [vmem:[%s1341_s21 + $0x598] sm:$0xff] %v602_v45  ;;  %v625_v29 = vadd.f32 %v1325_v1, %v367_v26  ;;  %v626_v30 = vadd.f32 %v1325_v1, %v368_v27  ;;  %v369_v31 = vld [vmem:[%s1318_s6 + $0x660] sm:$0xff]  ;;  %v370_v32 = vld [vmem:[%s1318_s6 + $0x668] sm:$0xff] }
  0x9d   : > { %859 = vst [vmem:[%s1341_s21 + $0x5a0] sm:$0xff] %v603_v49  ;;  %860 = vst [vmem:[%s1341_s21 + $0x5a8] sm:$0xff] %v604_v50  ;;  %v371_v33 = vld [vmem:[%s1318_s6 + $0x670] sm:$0xff]  ;;  %v627_v34 = vadd.f32 %v1325_v1, %v369_v31  ;;  %v628_v35 = vadd.f32 %v1325_v1, %v370_v32  ;;  %v372_v37 = vld [vmem:[%s1318_s6 + $0x678] sm:$0xff] }
  0x9e   : > { %861 = vst [vmem:[%s1341_s21 + $0x5b0] sm:$0xff] %v605_v51  ;;  %862 = vst [vmem:[%s1341_s21 + $0x5b8] sm:$0xff] %v606_v55  ;;  %v629_v36 = vadd.f32 %v1325_v1, %v371_v33  ;;  %v373_v38 = vld [vmem:[%s1318_s6 + $0x680] sm:$0xff]  ;;  %v374_v39 = vld [vmem:[%s1318_s6 + $0x688] sm:$0xff]  ;;  %v630_v40 = vadd.f32 %v1325_v1, %v372_v37 }
  0x9f   : > { %863 = vst [vmem:[%s1341_s21 + $0x5c0] sm:$0xff] %v607_v56  ;;  %864 = vst [vmem:[%s1341_s21 + $0x5c8] sm:$0xff] %v608_v57  ;;  %v631_v41 = vadd.f32 %v1325_v1, %v373_v38  ;;  %v632_v42 = vadd.f32 %v1325_v1, %v374_v39  ;;  %v375_v43 = vld [vmem:[%s1318_s6 + $0x690] sm:$0xff]  ;;  %v376_v44 = vld [vmem:[%s1318_s6 + $0x698] sm:$0xff] }
  0xa0   : > { %865 = vst [vmem:[%s1341_s21 + $0x5d0] sm:$0xff] %v609_v61  ;;  %866 = vst [vmem:[%s1341_s21 + $0x5d8] sm:$0xff] %v610_v62  ;;  %v377_v45 = vld [vmem:[%s1318_s6 + $0x6a0] sm:$0xff]  ;;  %v633_v46 = vadd.f32 %v1325_v1, %v375_v43  ;;  %v634_v47 = vadd.f32 %v1325_v1, %v376_v44  ;;  %v378_v49 = vld [vmem:[%s1318_s6 + $0x6a8] sm:$0xff] }
  0xa1   : > { %867 = vst [vmem:[%s1341_s21 + $0x5e0] sm:$0xff] %v611_v63  ;;  %868 = vst [vmem:[%s1341_s21 + $0x5e8] sm:$0xff] %v612_v4  ;;  %v635_v48 = vadd.f32 %v1325_v1, %v377_v45  ;;  %v379_v50 = vld [vmem:[%s1318_s6 + $0x6b0] sm:$0xff]  ;;  %v380_v51 = vld [vmem:[%s1318_s6 + $0x6b8] sm:$0xff]  ;;  %v636_v52 = vadd.f32 %v1325_v1, %v378_v49 }
  0xa2   : > { %869 = vst [vmem:[%s1341_s21 + $0x5f0] sm:$0xff] %v613_v5  ;;  %870 = vst [vmem:[%s1341_s21 + $0x5f8] sm:$0xff] %v614_v6  ;;  %v637_v53 = vadd.f32 %v1325_v1, %v379_v50  ;;  %v638_v54 = vadd.f32 %v1325_v1, %v380_v51  ;;  %v381_v55 = vld [vmem:[%s1318_s6 + $0x6c0] sm:$0xff]  ;;  %v382_v56 = vld [vmem:[%s1318_s6 + $0x6c8] sm:$0xff] }
  0xa3   : > { %871 = vst [vmem:[%s1341_s21 + $0x600] sm:$0xff] %v615_v10  ;;  %872 = vst [vmem:[%s1341_s21 + $0x608] sm:$0xff] %v616_v11  ;;  %v383_v57 = vld [vmem:[%s1318_s6 + $0x6d0] sm:$0xff]  ;;  %v639_v58 = vadd.f32 %v1325_v1, %v381_v55  ;;  %v640_v59 = vadd.f32 %v1325_v1, %v382_v56  ;;  %v384_v61 = vld [vmem:[%s1318_s6 + $0x6d8] sm:$0xff] }
  0xa4   : > { %873 = vst [vmem:[%s1341_s21 + $0x610] sm:$0xff] %v617_v12  ;;  %874 = vst [vmem:[%s1341_s21 + $0x618] sm:$0xff] %v618_v16  ;;  %v641_v60 = vadd.f32 %v1325_v1, %v383_v57  ;;  %v385_v62 = vld [vmem:[%s1318_s6 + $0x6e0] sm:$0xff]  ;;  %v386_v63 = vld [vmem:[%s1318_s6 + $0x6e8] sm:$0xff]  ;;  %v642_v0 = vadd.f32 %v1325_v1, %v384_v61 }
  0xa5   : > { %875 = vst [vmem:[%s1341_s21 + $0x620] sm:$0xff] %v619_v17  ;;  %876 = vst [vmem:[%s1341_s21 + $0x628] sm:$0xff] %v620_v18  ;;  %v643_v2 = vadd.f32 %v1325_v1, %v385_v62  ;;  %v644_v3 = vadd.f32 %v1325_v1, %v386_v63  ;;  %v387_v4 = vld [vmem:[%s1318_s6 + $0x6f0] sm:$0xff]  ;;  %v388_v5 = vld [vmem:[%s1318_s6 + $0x6f8] sm:$0xff] }
  0xa6   : > { %877 = vst [vmem:[%s1341_s21 + $0x630] sm:$0xff] %v621_v22  ;;  %878 = vst [vmem:[%s1341_s21 + $0x638] sm:$0xff] %v622_v23  ;;  %v389_v6 = vld [vmem:[%s1318_s6 + $0x700] sm:$0xff]  ;;  %v645_v7 = vadd.f32 %v1325_v1, %v387_v4  ;;  %v646_v8 = vadd.f32 %v1325_v1, %v388_v5  ;;  %v390_v10 = vld [vmem:[%s1318_s6 + $0x708] sm:$0xff] }
  0xa7   : > { %879 = vst [vmem:[%s1341_s21 + $0x640] sm:$0xff] %v623_v24  ;;  %880 = vst [vmem:[%s1341_s21 + $0x648] sm:$0xff] %v624_v28  ;;  %v647_v9 = vadd.f32 %v1325_v1, %v389_v6  ;;  %v391_v11 = vld [vmem:[%s1318_s6 + $0x710] sm:$0xff]  ;;  %v392_v12 = vld [vmem:[%s1318_s6 + $0x718] sm:$0xff]  ;;  %v648_v13 = vadd.f32 %v1325_v1, %v390_v10 }
  0xa8   : > { %881 = vst [vmem:[%s1341_s21 + $0x650] sm:$0xff] %v625_v29  ;;  %882 = vst [vmem:[%s1341_s21 + $0x658] sm:$0xff] %v626_v30  ;;  %v649_v14 = vadd.f32 %v1325_v1, %v391_v11  ;;  %v650_v15 = vadd.f32 %v1325_v1, %v392_v12  ;;  %v393_v16 = vld [vmem:[%s1318_s6 + $0x720] sm:$0xff]  ;;  %v394_v17 = vld [vmem:[%s1318_s6 + $0x728] sm:$0xff] }
  0xa9   : > { %883 = vst [vmem:[%s1341_s21 + $0x660] sm:$0xff] %v627_v34  ;;  %884 = vst [vmem:[%s1341_s21 + $0x668] sm:$0xff] %v628_v35  ;;  %v395_v18 = vld [vmem:[%s1318_s6 + $0x730] sm:$0xff]  ;;  %v651_v19 = vadd.f32 %v1325_v1, %v393_v16  ;;  %v652_v20 = vadd.f32 %v1325_v1, %v394_v17  ;;  %v396_v22 = vld [vmem:[%s1318_s6 + $0x738] sm:$0xff] }
  0xaa   : > { %885 = vst [vmem:[%s1341_s21 + $0x670] sm:$0xff] %v629_v36  ;;  %886 = vst [vmem:[%s1341_s21 + $0x678] sm:$0xff] %v630_v40  ;;  %v653_v21 = vadd.f32 %v1325_v1, %v395_v18  ;;  %v397_v23 = vld [vmem:[%s1318_s6 + $0x740] sm:$0xff]  ;;  %v398_v24 = vld [vmem:[%s1318_s6 + $0x748] sm:$0xff]  ;;  %v654_v25 = vadd.f32 %v1325_v1, %v396_v22 }
  0xab   : > { %887 = vst [vmem:[%s1341_s21 + $0x680] sm:$0xff] %v631_v41  ;;  %888 = vst [vmem:[%s1341_s21 + $0x688] sm:$0xff] %v632_v42  ;;  %v655_v26 = vadd.f32 %v1325_v1, %v397_v23  ;;  %v656_v27 = vadd.f32 %v1325_v1, %v398_v24  ;;  %v399_v28 = vld [vmem:[%s1318_s6 + $0x750] sm:$0xff]  ;;  %v400_v29 = vld [vmem:[%s1318_s6 + $0x758] sm:$0xff] }
  0xac   : > { %889 = vst [vmem:[%s1341_s21 + $0x690] sm:$0xff] %v633_v46  ;;  %890 = vst [vmem:[%s1341_s21 + $0x698] sm:$0xff] %v634_v47  ;;  %v401_v30 = vld [vmem:[%s1318_s6 + $0x760] sm:$0xff]  ;;  %v657_v31 = vadd.f32 %v1325_v1, %v399_v28  ;;  %v658_v32 = vadd.f32 %v1325_v1, %v400_v29  ;;  %v402_v34 = vld [vmem:[%s1318_s6 + $0x768] sm:$0xff] }
  0xad   : > { %891 = vst [vmem:[%s1341_s21 + $0x6a0] sm:$0xff] %v635_v48  ;;  %892 = vst [vmem:[%s1341_s21 + $0x6a8] sm:$0xff] %v636_v52  ;;  %v659_v33 = vadd.f32 %v1325_v1, %v401_v30  ;;  %v403_v35 = vld [vmem:[%s1318_s6 + $0x770] sm:$0xff]  ;;  %v404_v36 = vld [vmem:[%s1318_s6 + $0x778] sm:$0xff]  ;;  %v660_v37 = vadd.f32 %v1325_v1, %v402_v34 }
  0xae   : > { %893 = vst [vmem:[%s1341_s21 + $0x6b0] sm:$0xff] %v637_v53  ;;  %894 = vst [vmem:[%s1341_s21 + $0x6b8] sm:$0xff] %v638_v54  ;;  %v661_v38 = vadd.f32 %v1325_v1, %v403_v35  ;;  %v662_v39 = vadd.f32 %v1325_v1, %v404_v36  ;;  %v405_v40 = vld [vmem:[%s1318_s6 + $0x780] sm:$0xff]  ;;  %v406_v41 = vld [vmem:[%s1318_s6 + $0x788] sm:$0xff] }
  0xaf   : > { %895 = vst [vmem:[%s1341_s21 + $0x6c0] sm:$0xff] %v639_v58  ;;  %896 = vst [vmem:[%s1341_s21 + $0x6c8] sm:$0xff] %v640_v59  ;;  %v407_v42 = vld [vmem:[%s1318_s6 + $0x790] sm:$0xff]  ;;  %v663_v43 = vadd.f32 %v1325_v1, %v405_v40  ;;  %v664_v44 = vadd.f32 %v1325_v1, %v406_v41  ;;  %v408_v46 = vld [vmem:[%s1318_s6 + $0x798] sm:$0xff] }
  0xb0   : > { %897 = vst [vmem:[%s1341_s21 + $0x6d0] sm:$0xff] %v641_v60  ;;  %898 = vst [vmem:[%s1341_s21 + $0x6d8] sm:$0xff] %v642_v0  ;;  %v665_v45 = vadd.f32 %v1325_v1, %v407_v42  ;;  %v409_v47 = vld [vmem:[%s1318_s6 + $0x7a0] sm:$0xff]  ;;  %v410_v48 = vld [vmem:[%s1318_s6 + $0x7a8] sm:$0xff]  ;;  %v666_v49 = vadd.f32 %v1325_v1, %v408_v46 }
  0xb1   : > { %899 = vst [vmem:[%s1341_s21 + $0x6e0] sm:$0xff] %v643_v2  ;;  %900 = vst [vmem:[%s1341_s21 + $0x6e8] sm:$0xff] %v644_v3  ;;  %v667_v50 = vadd.f32 %v1325_v1, %v409_v47  ;;  %v668_v51 = vadd.f32 %v1325_v1, %v410_v48  ;;  %v411_v52 = vld [vmem:[%s1318_s6 + $0x7b0] sm:$0xff]  ;;  %v412_v53 = vld [vmem:[%s1318_s6 + $0x7b8] sm:$0xff] }
  0xb2   : > { %901 = vst [vmem:[%s1341_s21 + $0x6f0] sm:$0xff] %v645_v7  ;;  %902 = vst [vmem:[%s1341_s21 + $0x6f8] sm:$0xff] %v646_v8  ;;  %v413_v54 = vld [vmem:[%s1318_s6 + $0x7c0] sm:$0xff]  ;;  %v669_v55 = vadd.f32 %v1325_v1, %v411_v52  ;;  %v670_v56 = vadd.f32 %v1325_v1, %v412_v53  ;;  %v414_v58 = vld [vmem:[%s1318_s6 + $0x7c8] sm:$0xff] }
  0xb3   : > { %903 = vst [vmem:[%s1341_s21 + $0x700] sm:$0xff] %v647_v9  ;;  %904 = vst [vmem:[%s1341_s21 + $0x708] sm:$0xff] %v648_v13  ;;  %v671_v57 = vadd.f32 %v1325_v1, %v413_v54  ;;  %v415_v59 = vld [vmem:[%s1318_s6 + $0x7d0] sm:$0xff]  ;;  %v416_v60 = vld [vmem:[%s1318_s6 + $0x7d8] sm:$0xff]  ;;  %v672_v61 = vadd.f32 %v1325_v1, %v414_v58 }
  0xb4   : > { %905 = vst [vmem:[%s1341_s21 + $0x710] sm:$0xff] %v649_v14  ;;  %906 = vst [vmem:[%s1341_s21 + $0x718] sm:$0xff] %v650_v15  ;;  %v673_v62 = vadd.f32 %v1325_v1, %v415_v59  ;;  %v674_v63 = vadd.f32 %v1325_v1, %v416_v60  ;;  %v417_v0 = vld [vmem:[%s1318_s6 + $0x7e0] sm:$0xff]  ;;  %v418_v2 = vld [vmem:[%s1318_s6 + $0x7e8] sm:$0xff] }
  0xb5   : > { %907 = vst [vmem:[%s1341_s21 + $0x720] sm:$0xff] %v651_v19  ;;  %908 = vst [vmem:[%s1341_s21 + $0x728] sm:$0xff] %v652_v20  ;;  %v419_v3 = vld [vmem:[%s1318_s6 + $0x7f0] sm:$0xff]  ;;  %v675_v4 = vadd.f32 %v1325_v1, %v417_v0  ;;  %v676_v5 = vadd.f32 %v1325_v1, %v418_v2  ;;  %v420_v7 = vld [vmem:[%s1318_s6 + $0x7f8] sm:$0xff] }
  0xb6   : > { %909 = vst [vmem:[%s1341_s21 + $0x730] sm:$0xff] %v653_v21  ;;  %910 = vst [vmem:[%s1341_s21 + $0x738] sm:$0xff] %v654_v25  ;;  %v677_v6 = vadd.f32 %v1325_v1, %v419_v3  ;;  %v678_v8 = vadd.f32 %v1325_v1, %v420_v7 }
  0xb7   : > { %911 = vst [vmem:[%s1341_s21 + $0x740] sm:$0xff] %v655_v26  ;;  %912 = vst [vmem:[%s1341_s21 + $0x748] sm:$0xff] %v656_v27 }
  0xb8   : > { %913 = vst [vmem:[%s1341_s21 + $0x750] sm:$0xff] %v657_v31  ;;  %914 = vst [vmem:[%s1341_s21 + $0x758] sm:$0xff] %v658_v32 }
  0xb9   : > { %915 = vst [vmem:[%s1341_s21 + $0x760] sm:$0xff] %v659_v33  ;;  %916 = vst [vmem:[%s1341_s21 + $0x768] sm:$0xff] %v660_v37 }
  0xba   : > { %917 = vst [vmem:[%s1341_s21 + $0x770] sm:$0xff] %v661_v38  ;;  %918 = vst [vmem:[%s1341_s21 + $0x778] sm:$0xff] %v662_v39 }
  0xbb   : > { %919 = vst [vmem:[%s1341_s21 + $0x780] sm:$0xff] %v663_v43  ;;  %920 = vst [vmem:[%s1341_s21 + $0x788] sm:$0xff] %v664_v44 }
  0xbc   : > { %921 = vst [vmem:[%s1341_s21 + $0x790] sm:$0xff] %v665_v45  ;;  %922 = vst [vmem:[%s1341_s21 + $0x798] sm:$0xff] %v666_v49 }
  0xbd   : > { %923 = vst [vmem:[%s1341_s21 + $0x7a0] sm:$0xff] %v667_v50  ;;  %924 = vst [vmem:[%s1341_s21 + $0x7a8] sm:$0xff] %v668_v51 }
  0xbe   : > { %925 = vst [vmem:[%s1341_s21 + $0x7b0] sm:$0xff] %v669_v55  ;;  %926 = vst [vmem:[%s1341_s21 + $0x7b8] sm:$0xff] %v670_v56 }
  0xbf   : > { %927 = vst [vmem:[%s1341_s21 + $0x7c0] sm:$0xff] %v671_v57  ;;  %928 = vst [vmem:[%s1341_s21 + $0x7c8] sm:$0xff] %v672_v61 }
  0xc0   : > { %929 = vst [vmem:[%s1341_s21 + $0x7d0] sm:$0xff] %v673_v62  ;;  %930 = vst [vmem:[%s1341_s21 + $0x7d8] sm:$0xff] %v674_v63 }
  0xc1   : > { %931 = vst [vmem:[%s1341_s21 + $0x7e0] sm:$0xff] %v675_v4  ;;  %932 = vst [vmem:[%s1341_s21 + $0x7e8] sm:$0xff] %v676_v5 }
  0xc2   : > { %933 = vst [vmem:[%s1341_s21 + $0x7f0] sm:$0xff] %v677_v6  ;;  %934 = vst [vmem:[%s1341_s21 + $0x7f8] sm:$0xff] %v678_v8 }
  0xc3   : > { %1131 = shalt.err (!%p1128_p2)
}
  0xc4   : > { %s1132_s18 = scalar_lea.hbm %s2093_s7, 32768  ;;  %s1136_s25 = scalar_lea.hbm %s2149_s2, 65536 }
  0xc5   : > { %p1133_p4 = scmp.ne.s32.totalorder %s2093_s7, %s1132_s18  ;;  %p1137_p9 = scmp.lt.u32.totalorder %s2093_s7, %s2149_s2 }
  0xc6   : > { %p1138_p1 = scmp.lt.u32.totalorder %s1136_s25, %s1132_s18  ;;  %p1140_p6 = scmp.lt.u32.totalorder %s1132_s18, %s2093_s7 }
  0xc7   : > { %p1134_p5 = pnand %p1133_p4, %p2156_p11 }
  0xc8   : > { %p1139_p3 = por %p1138_p1, %p1137_p9 }
  0xc9   : > { %p1135_p7 = pneg %p1134_p5 }
  0xca   : > { %p1141_p12 = por %p1140_p6, %p1139_p3 }
  0xcc   : > { %p1142_p13 = pnand %p1141_p12, %p1135_p7 }
  0xce   : > { %1145 = shalt.err (!%p1142_p13)
}
  0xcf   : > { %s1190_s30 = smov 128   ;;  %s1191_s6 = smov 8  }
  0xd0   : > { %1040 = dma.vmem_to_hbm [thread:$0]  (%p2156_p11), %s2095_s4, 32768, %s2093_s7, %s936_s8, %s1190_s30, %s1190_s30, %s1191_s6  }
  0xd1 PF: > { %s964_s29 = sand.u32 1, %s1172_s11   ;;  %p2157_p8 = scmp.ne.s32.totalorder %s2154_s23, 0 }
  0xd2   : > { %p2158_p10 = scmp.ge.s32.totalorder %s1184_s14, 2  ;;  %s965_s21 = scalar_lea.sflag [#allocation5], %s964_s29 }
  0xd4   : > { %p1047_p0 = pnand %p2158_p10, %p2157_p8 }
  0xd6   : > { %1167 = dma.done.wait (!%p1047_p0), %s965_s21, 32768  }
  0xd7   : > { %1169 = vsyncadd (!%p1047_p0), %s965_s21, 4294934528  ;;  %p16_p2 = scmp.ge.s32.totalorder %s1235_s16, 4   ;;  %s2159_s11 = smov %s1176_s12 }
  0xd8   : > { %s2160_s12 = smov %s1180_s13  ;;  %s2161_s13 = smov %s1247_s19 }
  0xd9   : > { %s2162_s14 = smov %s1235_s16  ;;  %18 = sbr.rel (!%p16_p2) target bundleno = 7 (0x7), region = 73 }
  0xe0   :  { %970 = vsyncpa [#allocation4], 1 }
  0xe1   :  { %972 = vsyncpa [#allocation4 + $0x1], 1 }
  0xe2   :  { %973 = vsyncpa [#allocation5], 1 }
  0xe3   :  { %975 = vsyncpa [#allocation5 + $0x1], 1 }

</bundles_post_ra>
